<compile_context>
chip_gen: v6e
topology: v6e:2x2x1
jax: 0.10.0
libtpu: 0.0.40
codegen_flags: <defaults>
</compile_context>

<pallas_src>
import jax
import jax.numpy as jnp
from jax.experimental import pallas as pl
from jax.experimental.pallas import tpu as pltpu


def make_relative_position_index(h, w):
    """Replicates the buffer computed in RelativePositionBias.__init__."""
    coords_h = jnp.arange(h)
    coords_w = jnp.arange(w)
    ch, cw = jnp.meshgrid(coords_h, coords_w, indexing="ij")
    coords_flatten = jnp.stack([ch, cw]).reshape(2, -1)              # (2, h*w)
    rel = coords_flatten[:, :, None] - coords_flatten[:, None, :]    # (2, S, S)
    rel = jnp.transpose(rel, (1, 2, 0))                              # (S, S, 2)
    rel = rel.at[:, :, 0].add(h - 1)
    rel = rel.at[:, :, 1].add(w - 1)
    # NOTE: matches the PyTorch code exactly (multiplies by 2*h-1, not 2*w-1);
    # as in the original module this is only self-consistent when h == w.
    rel = rel.at[:, :, 0].multiply(2 * h - 1)
    return rel.sum(-1).astype(jnp.int32)                             # (S, S)


def _expand_rows_kernel(bias_ref, out_ref):
    # bias_ref: (num_heads, 1, 1, W*S)    out_ref: (num_heads, 1, bh, W*S)
    # Pure repeat_interleave along H: broadcast the resident bias row over the
    # bh output rows of this tile.  Sublane broadcast only; stores are
    # lane-dense along W*S, so the kernel sits at the output-write floor.
    out_ref[...] = jnp.broadcast_to(bias_ref[...], out_ref.shape)


def _pad(x, m):
    return -(-x // m) * m


def _vmem_capacity_bytes():
    try:
        return int(pltpu.get_tpu_info().vmem_capacity_bytes)
    except Exception:
        return 64 << 20            # conservative v7x floor; v5e/v6e have 128 MiB


def _pick_bh(rh, row_bytes, budget):
    """Rows per output tile: largest divisor of rh that is either rh itself or
    a multiple of 8 (keeps the (8,128) block rule) and fits the VMEM budget."""
    cands = [d for d in range(rh, 0, -1)
             if rh % d == 0 and (d == rh or d % 8 == 0)]
    for d in cands:
        if d * row_bytes <= budget:
            return d
    return cands[-1]


def relative_position_bias(table, index, *, num_heads, h, w, H, W):
    """table: ((2h-1)*(2w-1), num_heads), index: (h*w, h*w) int32.

    Returns (1, num_heads, H*W, h*w), matching the PyTorch forward.
    """
    assert H % h == 0 and W % w == 0, "H, W must be multiples of (h, w)"
    S = h * w
    rh, rw = H // h, W // w
    M = W * S                                   # lane-dense run per output row

    # --- tiny, done once in plain XLA (few KB .. ~output/rh bytes) ----------
    bias = table[index.reshape(-1)].reshape(S, S, num_heads)         # (S,S,nh)
    bias = jnp.transpose(bias, (2, 0, 1)).reshape(num_heads, h, w, S)
    bias_w = jnp.repeat(bias, rw, axis=2)                            # (nh,h,W,S)
    bias_w = bias_w.reshape(num_heads, h, 1, M).astype(jnp.float32)

    # --- generation-aware tiling / VMEM budgeting ----------------------------
    cap = _vmem_capacity_bytes()
    lane = _pad(M, 128)
    row_bytes = num_heads * lane * 4            # one output sublane-row, padded
    bh = _pick_bh(rh, row_bytes, cap // 6)      # out tile (nh, 1, bh, M)

    in_blk = num_heads * 8 * lane * 4           # sublane dim 1 pads to 8
    out_blk = num_heads * _pad(bh, 8) * lane * 4
    vmem_needed = 2 * (in_blk + out_blk) + (2 << 20)
    vmem_bytes = int(min(max(vmem_needed, 8 << 20), int(cap * 0.9)))

    grid = (h, rh // bh)                        # >= 2 steps -> megacore shards

    out = pl.pallas_call(
        _expand_rows_kernel,
        out_shape=jax.ShapeDtypeStruct((num_heads, h, rh, M), jnp.float32),
        grid_spec=pltpu.PrefetchScalarGridSpec(
            num_scalar_prefetch=0,
            grid=grid,
            in_specs=[pl.BlockSpec((num_heads, 1, 1, M),
                                   lambda i, a: (0, i, 0, 0))],
            out_specs=pl.BlockSpec((num_heads, 1, bh, M),
                                   lambda i, a: (0, i, a, 0)),
        ),
        compiler_params=pltpu.CompilerParams(
            dimension_semantics=("parallel", "parallel"),
            vmem_limit_bytes=vmem_bytes),
    )(bias_w)

    # Free layout plumbing: (nh, h, rh, W*S) row-major == (nh, H*W, S).
    return out.reshape(1, num_heads, H * W, S)


def reference(table, index, *, num_heads, h, w, H, W):
    """Pure-JAX transcription of the PyTorch forward, for verification."""
    S = h * w
    bias = table[index.reshape(-1)].reshape(h, w, S, num_heads)
    bias = jnp.repeat(bias, H // h, axis=0)
    bias = jnp.repeat(bias, W // w, axis=1)
    bias = bias.reshape(H * W, S, num_heads)
    return jnp.transpose(bias, (2, 0, 1))[None]


if __name__ == "__main__":
    num_heads, h, w = 4, 4, 4
    H, W = 8, 8                       # forward(H, W); multiples of (h, w)

    key = jax.random.PRNGKey(0)
    table = (jax.random.normal(key, ((2 * h - 1) * (2 * w - 1), num_heads),
                               dtype=jnp.float32) * 0.02)
    index = make_relative_position_index(h, w)

    out = relative_position_bias(table, index,
                                 num_heads=num_heads, h=h, w=w, H=H, W=W)
    out = jax.block_until_ready(out)

    expected = reference(table, index, num_heads=num_heads, h=h, w=w, H=H, W=W)
    assert out.shape == (1, num_heads, H * W, h * w), out.shape
    assert jnp.allclose(out, expected, atol=1e-6), "mismatch vs reference"

    print("KERNEL_OK")
</pallas_src>

<mosaic_0001>
module attributes {stable_mosaic.version = 11 : i64} {
  func.func @_expand_rows_kernel(%arg0: i32, %arg1: i32, %arg2: memref<4x1x1x128xf32, #tpu.memory_space<vmem>>, %arg3: memref<4x1x2x128xf32, #tpu.memory_space<vmem>>) attributes {dimension_semantics = [#tpu.dimension_semantics<parallel>, #tpu.dimension_semantics<parallel>], iteration_bounds = array<i64: 4, 1>, scalar_prefetch = 0 : i64, scratch_operands = 0 : i64, tpu.core_type = #tpu.core_type<tc>, window_params = [{transform_indices = @transform_0, window_bounds = array<i64: 4, 1, 1, 128>}, {transform_indices = @transform_1, window_bounds = array<i64: 4, 1, 2, 128>}]} {
    %c0 = arith.constant 0 : index
    %c0_0 = arith.constant 0 : index
    %c0_1 = arith.constant 0 : index
    %c0_2 = arith.constant 0 : index
    %0 = vector.load %arg2[%c0, %c0_0, %c0_1, %c0_2] : memref<4x1x1x128xf32, #tpu.memory_space<vmem>>, vector<4x1x1x128xf32>
    %1 = vector.shape_cast %0 : vector<4x1x1x128xf32> to vector<4x1x1x128xf32>
    %2 = vector.broadcast %1 : vector<4x1x1x128xf32> to vector<4x1x2x128xf32>
    %c0_3 = arith.constant 0 : index
    %c0_4 = arith.constant 0 : index
    %c0_5 = arith.constant 0 : index
    %c0_6 = arith.constant 0 : index
    %3 = vector.load %arg3[%c0_3, %c0_4, %c0_5, %c0_6] : memref<4x1x2x128xf32, #tpu.memory_space<vmem>>, vector<4x1x2x128xf32>
    tpu.vector_store %arg3[%c0_3, %c0_4, %c0_5, %c0_6], %2 {strides = array<i32>} : memref<4x1x2x128xf32, #tpu.memory_space<vmem>>, vector<4x1x2x128xf32>,
    return
  }
  func.func @transform_0(%arg0: i32, %arg1: i32) -> (i32, i32, i32, i32) {
    %c0_i32 = arith.constant 0 : i32
    %c0_i32_0 = arith.constant 0 : i32
    %c0_i32_1 = arith.constant 0 : i32
    %c0_i32_2 = arith.constant 0 : i32
    return %c0_i32, %arg0, %c0_i32_0, %c0_i32_1 : i32, i32, i32, i32
  }
  func.func @transform_1(%arg0: i32, %arg1: i32) -> (i32, i32, i32, i32) {
    %c0_i32 = arith.constant 0 : i32
    %c0_i32_0 = arith.constant 0 : i32
    %c0_i32_1 = arith.constant 0 : i32
    return %c0_i32, %arg0, %arg1, %c0_i32_0 : i32, i32, i32, i32
  }
}

</mosaic_0001>

<bundles_post_ra>
// kernel: tpu_custom_call.1
= control target key start
LH: loop header
LB: loop body
LE: loop exit
PB: predicated region body
PF: predicated region fallthrough
CT: control target
= control target key end

     0   :  { %6 = vsyncpa [#allocation3], 0  ;;  %s632_s0 = inlined_call_operand.hbm [shape: f32[4,4,1,128], index: 0, kind: input, shape index: {}]   ;;  %s633_s1 = inlined_call_operand.hbm [shape: f32[4,4,2,128], index: 1, kind: output, shape index: {}]  }
   0x1   :  { %8 = vsyncpa [#allocation3 + $0x1], 0 }
   0x2   :  { %9 = vsyncpa [#allocation4], 0 }
   0x3   :  { %11 = vsyncpa [#allocation4 + $0x1], 0  ;;  %s489_s6 = smov 0   ;;  %s491_s7 = smov 0  }
   0x4   :  { %s493_s8 = smov 0   ;;  %s495_s9 = smov 0  }
   0x5   :  { %s497_s10 = smov 0   ;;  %s499_s11 = smov 0  }
   0x6 LB: > { %s276_s12 = sadd.s32 4294967295, %s469_s11   ;;  %s277_s13 = sadd.s32 4294967294, %s469_s11   ;;  %s469_s11 = sphi %s499_s11, %s17_s11   ;;  %s465_s10 = sphi %s497_s10, %s643_s10   ;;  %s461_s9 = sphi %s495_s9, %s642_s9   ;;  %s457_s8 = sphi %s493_s8, %s641_s8   ;;  %s453_s7 = sphi %s491_s7, %s640_s7   ;;  %s449_s6 = sphi %s489_s6, %s639_s6  }
   0x7   : > { %s29_s14 = sadd.s32 1, %s465_s10  ;;  %s36_s15 = sadd.s32 1, %s457_s8 }
   0x8   : > { %p31_p0 = scmp.ge.s32.totalorder %s29_s14, 4  ;;  %p43_p1 = scmp.ne.s32.totalorder %s457_s8, %s453_s7 }
   0x9   : > { %p44_p2 = scmp.eq.s32.totalorder %s469_s11, 0  ;;  %p49_p3 = scmp.ne.s32.totalorder %s453_s7, %s449_s6 }
   0xa   : > { %s645_s14 = smov (%p31_p0, %s29_s14), 0  ;;  %p50_p5 = scmp.eq.s32.totalorder %s276_s12, 0 }
   0xb   : > { %p530_p4 = por %p44_p2, %p43_p1  ;;  %s33_s17 = ssub.s32 %s465_s10, %s645_s14 }
   0xc   : > { %p75_p6 = scmp.eq.s32.totalorder %s276_s12, 3  ;;  %p34_p7 = scmp.eq.s32.totalorder %s33_s17, 0 }
   0xd   : > { %p536_p8 = por %p50_p5, %p49_p3  ;;  %p81_p10 = scmp.eq.s32.totalorder %s277_s13, 3 }
   0xe   : > { %p540_p9 = por %p75_p6, %p43_p1  ;;  %p305_p12 = scmp.lt.s32.totalorder %s469_s11, 4 }
   0xf   : > { %s545_s20 = scalar_select %p34_p7, %s457_s8, %s36_s15  }
  0x10   : > { %p547_p11 = por %p81_p10, %p49_p3  ;;  %s101_s22 = sand.u32 1, %s457_s8  }
  0x11   : > { %s280_s23 = sshll.u32 %s101_s22, 2  ;;  %s281_s24 = sshll.u32 %s465_s10, 4 }
  0x12   : > { %s110_s27 = scalar_lea.hbm %s632_s0, %s281_s24  ;;  %s105_s28 = scalar_lea.vmem [#allocation2], %s280_s23 }
  0x13   : > { %s111_s29 = sshll.u32 %s105_s28, 4  ;;  %p559_p13 = pnand %p305_p12, %p530_p4  ;;  %s112_s29 = int_to_ptr.vmem [resolvable:$true] %s111_s29 }
  0x14   : > { %s102_s2 = scalar_lea.sflag [#allocation3], %s101_s22  ;;  %s374_s3 = scalar_lea.vmem %s112_s29, 64 }
  0x15   : > { %p363_p0 = pneg %p559_p13  ;;  %p375_p1 = scmp.ne.s32.totalorder %s112_s29, %s374_s3 }
  0x16   : > { %s471_s4 = smov [#allocation2]  }
  0x17   : > { %p377_p2 = pnand %p375_p1, %p363_p0  ;;  %s379_s5 = sshll.u32 %s471_s4, 4  ;;  %s380_s5 = int_to_ptr.vmem [resolvable:$false] %s379_s5 }
  0x18   : > { %s381_s12 = scalar_lea.vmem %s380_s5, 128  ;;  %p382_p5 = scmp.lt.s32.totalorder %s112_s29, %s380_s5 }
  0x19   : > { %p378_p3 = pneg %p377_p2  ;;  %p383_p6 = scmp.lt.s32.totalorder %s381_s12, %s374_s3 }
  0x1b   : > { %p384_p7 = por %p383_p6, %p382_p5 }
  0x1d   : > { %p385_p10 = pnand %p384_p7, %p378_p3 }
  0x1f   : > { %388 = shalt.err (!%p385_p10)
}
  0x20   : > { %s472_s13 = smov 64   ;;  %s473_s15 = smov 16  }
  0x21   : > { %s474_s16 = smov 1   ;;  %p282_p4 = scmp.ge.s32.totalorder %s469_s11, 1 }
  0x22   : > { %300 = dma.hbm_to_vmem [thread:$0]  (!%p559_p13), %s110_s27, 64, %s112_s29, %s102_s2, %s472_s13, %s473_s15, %s474_s16  }
  0x23   : > { %p119_p12 = scmp.lt.s32.totalorder %s469_s11, 5 }
  0x25   : > { %p120_p0 = pnand %p282_p4, %p119_p12 }
  0x26   : > { %s570_s17 = sand.u32 (!%p120_p0), 1, %s453_s7  }
  0x27   : > { %123 = sbr.rel (%p120_p0) target bundleno = 72 (0x48), region = 24  ;;  %s283_s22 = sshll.u32 (!%p120_p0), %s570_s17, 2 }
  0x28   : > { %s126_s23 = scalar_lea.sflag (!%p120_p0), [#allocation3], %s570_s17  ;;  %s129_s24 = scalar_lea.vmem (!%p120_p0), [#allocation2], %s283_s22 }
  0x2c   : > { %440 = dma.done.wait (%p536_p8), %s126_s23, 64  }
  0x2d   : > { %442 = vsyncadd (%p536_p8), %s126_s23, 4294967232  ;;  %s284_s25 = sshll.u32 %s570_s17, 3  ;;  %s290_s28 = sshll.u32 %s461_s9, 5  ;;  %v285_v0 = vld [vmem:[%s129_s24] ss:$0 sm:$0xff] }
  0x2e   : > { %s147_s26 = scalar_lea.vmem [#allocation5], %s284_s25  ;;  %v286_v1 = vld [vmem:[%s129_s24 + $0x1] ss:$0 sm:$0xff]  ;;  %v287_v2 = vld [vmem:[%s129_s24 + $0x2] ss:$0 sm:$0xff]  ;;  %s585_s18 = scalar_lea.hbm %s633_s1, %s290_s28 }
  0x2f   : > { %s194_s27 = sshll.u32 %s147_s26, 4  ;;  %176 = vst [vmem:[%s147_s26] sm:$0x3] %v285_v0  ;;  %177 = vst [vmem:[%s147_s26 + $0x2] sm:$0x3] %v286_v1  ;;  %v288_v3 = vld [vmem:[%s129_s24 + $0x3] ss:$0 sm:$0xff]  ;;  %s580_s27 = int_to_ptr.vmem [resolvable:$true] %s194_s27 }
  0x30   : > { %178 = vst [vmem:[%s147_s26 + $0x4] sm:$0x3] %v287_v2  ;;  %179 = vst [vmem:[%s147_s26 + $0x6] sm:$0x3] %v288_v3  ;;  %s181_s2 = scalar_lea.sflag [#allocation4], %s570_s17  ;;  %s389_s9 = scalar_lea.vmem %s580_s27, 128 }
  0x31   : > { %p390_p8 = scmp.ne.s32.totalorder %s580_s27, %s389_s9  ;;  %s475_s3 = smov [#allocation5]  }
  0x32   : > { %s393_s4 = sshll.u32 %s475_s3, 4  ;;  %s394_s4 = int_to_ptr.vmem [resolvable:$false] %s393_s4 }
  0x33   : > { %p391_p13 = pnand %p390_p8, %p540_p9  ;;  %s395_s5 = scalar_lea.vmem %s394_s4, 256 }
  0x34   : > { %p396_p2 = scmp.lt.s32.totalorder %s580_s27, %s394_s4  ;;  %p397_p3 = scmp.lt.s32.totalorder %s395_s5, %s389_s9 }
  0x35   : > { %p392_p1 = pneg %p391_p13 }
  0x36   : > { %p398_p5 = por %p397_p3, %p396_p2 }
  0x38   : > { %p399_p6 = pnand %p398_p5, %p392_p1 }
  0x3a   : > { %402 = shalt.err (!%p399_p6)
}
  0x3b   : > { %s403_s12 = scalar_lea.hbm %s585_s18, 128  ;;  %s407_s16 = scalar_lea.hbm %s633_s1, 512 }
  0x3c   : > { %p404_p7 = scmp.ne.s32.totalorder %s585_s18, %s403_s12  ;;  %p408_p12 = scmp.lt.s32.totalorder %s585_s18, %s633_s1 }
  0x3d   : > { %p409_p0 = scmp.lt.s32.totalorder %s407_s16, %s403_s12 }
  0x3e   : > { %p405_p10 = pnand %p404_p7, %p540_p9 }
  0x3f   : > { %p410_p8 = por %p409_p0, %p408_p12 }
  0x40   : > { %p406_p4 = pneg %p405_p10 }
  0x42   : > { %p411_p13 = pnand %p410_p8, %p406_p4 }
  0x44   : > { %414 = shalt.err (!%p411_p13)
}
  0x45   : > { %s476_s24 = smov 32   ;;  %s477_s25 = smov 128  }
  0x46   : > { %s478_s26 = smov 2  }
  0x47   : > { %295 = dma.vmem_to_hbm [thread:$0]  (%p540_p9), %s580_s27, 128, %s585_s18, %s181_s2, %s476_s24, %s477_s25, %s478_s26  }
  0x48 PF: > { %p306_p1 = scmp.ge.s32.totalorder %s469_s11, 2  ;;  %s209_s28 = sand.u32 1, %s449_s6  }
  0x49   : > { %s210_s29 = scalar_lea.sflag [#allocation4], %s209_s28 }
  0x4a   : > { %p302_p2 = pnand %p306_p1, %p547_p11 }
  0x4c   : > { %p303_p3 = pneg %p302_p2 }
  0x4e   : > { %444 = dma.done.wait (%p303_p3), %s210_s29, 128  }
  0x4f   : > { %446 = vsyncadd (%p303_p3), %s210_s29, 4294967168  ;;  %s17_s11 = sadd.s32 1, %s469_s11   ;;  %s639_s6 = smov %s453_s7 }
  0x50   : > { %p14_p5 = scmp.ge.s32.totalorder %s17_s11, 6   ;;  %s640_s7 = smov %s457_s8 }
  0x51   : > { %s641_s8 = smov %s545_s20  ;;  %s642_s9 = smov %s465_s10 }
  0x52   : > { %s643_s10 = smov %s645_s14  ;;  %16 = sbr.rel (!%p14_p5) target bundleno = 6 (0x6), region = 69 }
  0x57   :  { %215 = vsyncpa [#allocation3], 1 }
  0x58   :  { %217 = vsyncpa [#allocation3 + $0x1], 1 }
  0x59   :  { %218 = vsyncpa [#allocation4], 1 }
  0x5a   :  { %220 = vsyncpa [#allocation4 + $0x1], 1 }

</bundles_post_ra>
